<compile_context>
chip_gen: v7x
topology: tpu7x:2x2x1
jax: 0.10.0
libtpu: 0.0.40
codegen_flags: <defaults>
</compile_context>

<pallas_src>
import functools

import numpy as np

import jax
import jax.numpy as jnp
from jax.experimental import pallas as pl
from jax.experimental.pallas import tpu as pltpu


# ---------------------------------------------------------------------------
# In-kernel helpers: one TV pair-term of one scale, on the full-resolution diff
# ---------------------------------------------------------------------------
def _tv_h(diff, step, rk, cp):
    """sum over valid horizontal pairs (c, c+step): |diff[:, c+step] - diff[:, c]|,
    restricted to rows r%step==0 (rk) and cols c%step==0 with c+step<W (cp)."""
    tr, w = diff.shape
    if w % 128 == 0 and tr % 8 == 0:
        # Full-width vregs: XLU rotate + VPU mask-multiply; wrap column masked by cp.
        g = jnp.abs(pltpu.roll(diff, shift=w - step, axis=1) - diff)
        return jnp.sum(g * rk * cp)
    # Tiny / unaligned shapes: aligned-start slices (exact, negligible cost here).
    g = jnp.abs(diff[:, step:] - diff[:, : w - step])
    return jnp.sum(g * rk * cp[:, : w - step])


def _tv_v(diff, step, rp, ck):
    """sum over valid vertical pairs (q, q+step): |diff[q+step, :] - diff[q, :]|,
    restricted to rows r%step==0 with r+step<H (rp) and cols c%step==0 (ck)."""
    tr, w = diff.shape
    if w % 128 == 0 and tr % 8 == 0:
        g = jnp.abs(pltpu.roll(diff, shift=tr - step, axis=0) - diff)
        return jnp.sum(g * rp * ck)
    g = jnp.abs(diff[step:, :] - diff[: tr - step, :])
    return jnp.sum(g * rp[: tr - step] * ck)


# ---------------------------------------------------------------------------
# Fused kernel: MSE numerator + per-scale gradient numerators
# ---------------------------------------------------------------------------
def _depth_loss_kernel(*refs, num_scales, H):
    if num_scales > 0:
        pred_ref, tgt_ref, rk_ref, rp_ref, ck_ref, cp_ref, out_ref = refs
    else:
        pred_ref, tgt_ref, out_ref = refs

    b = pl.program_id(1)  # reduction ("arbitrary") axis

    @pl.when(b == 0)
    def _init():
        out_ref[...] = jnp.zeros_like(out_ref)

    diff = pred_ref[...].astype(jnp.float32) - tgt_ref[...].astype(jnp.float32)
    _, w = diff.shape

    def accumulate(i, val):
        # Each partial sum owns one (8, 128) band of the resident accumulator;
        # scalar-broadcast adds keep stores full-vreg and lane-dense.
        out_ref[0, 8 * i:8 * (i + 1), :] = out_ref[0, 8 * i:8 * (i + 1), :] + val

    # data term (MSE numerator)
    accumulate(0, jnp.sum(diff * diff))

    # multi-scale gradient numerators, all on the in-VMEM full-resolution diff
    for s in range(num_scales):
        step = 1 << s
        part = jnp.float32(0.0)
        if step < w:                       # downsampled width >= 2
            part = part + _tv_h(diff, step, rk_ref[s], cp_ref[s])
        if step < H:                       # downsampled height >= 2
            part = part + _tv_v(diff, step, rp_ref[s], ck_ref[s])
        accumulate(1 + s, part)


# ---------------------------------------------------------------------------
# Host-side constant (separable 0/1 weight) construction — built once, hoisted
# ---------------------------------------------------------------------------
def _build_masks(S, Bb, H, W):
    TR = Bb * H
    r = np.arange(TR) % H
    c = np.arange(W)
    rk = np.zeros((S, TR), np.float32)   # row keep:  r % step == 0
    rp = np.zeros((S, TR), np.float32)   # row pair:  keep and r+step < H
    ck = np.zeros((S, W), np.float32)    # col keep:  c % step == 0
    cp = np.zeros((S, W), np.float32)    # col pair:  keep and c+step < W
    for s in range(S):
        st = 1 << s
        rk[s] = (r % st == 0)
        rp[s] = (r % st == 0) & (r + st < H)
        ck[s] = (c % st == 0)
        cp[s] = (c % st == 0) & (c + st < W)
    return (rk.reshape(S, TR, 1), rp.reshape(S, TR, 1),
            ck.reshape(S, 1, W), cp.reshape(S, 1, W))


# ---------------------------------------------------------------------------
# DepthLoss forward (batch-based reduction, all-ones mask)
# ---------------------------------------------------------------------------
@functools.partial(jax.jit, static_argnames=("alpha", "scales"))
def depth_loss(prediction, target, alpha=0.5, scales=4):
    B, H, W = prediction.shape
    S = int(scales) if alpha > 0 else 0
    n_out = 1 + S

    # --- choose images per grid step: target ~2 MiB f32 blocks -------------
    target_bytes = 2 << 20
    max_rows = 1024
    Bb = 1
    for cand in range(B, 0, -1):
        if (B % cand == 0
                and cand * H * W * 4 <= target_bytes
                and cand * H <= max_rows
                and ((cand * H) % 8 == 0 or cand == B)):
            Bb = cand
            break
    TR = Bb * H
    nblk = B // Bb

    # --- leading parallel axis (v7x second TensorCore); reduction axis last --
    P = 2 if (nblk % 2 == 0 and nblk >= 2) else 1
    nblk_pp = nblk // P

    pred2 = prediction.reshape(B * H, W)     # free: contiguous in HBM
    tgt2 = target.reshape(B * H, W)

    kernel = functools.partial(_depth_loss_kernel, num_scales=S, H=H)

    in_specs = [
        pl.BlockSpec((TR, W), lambda p, b: (p * nblk_pp + b, 0)),
        pl.BlockSpec((TR, W), lambda p, b: (p * nblk_pp + b, 0)),
    ]
    args = [pred2, tgt2]
    if S > 0:
        rk, rp, ck, cp = _build_masks(S, Bb, H, W)
        # constant block index -> DMA'd once, never regenerated per step
        in_specs += [
            pl.BlockSpec((S, TR, 1), lambda p, b: (0, 0, 0)),
            pl.BlockSpec((S, TR, 1), lambda p, b: (0, 0, 0)),
            pl.BlockSpec((S, 1, W), lambda p, b: (0, 0, 0)),
            pl.BlockSpec((S, 1, W), lambda p, b: (0, 0, 0)),
        ]
        args += [jnp.asarray(rk), jnp.asarray(rp), jnp.asarray(ck), jnp.asarray(cp)]

    out_shape = jax.ShapeDtypeStruct((P, n_out * 8, 128), jnp.float32)
    out_specs = pl.BlockSpec((1, n_out * 8, 128), lambda p, b: (p, 0, 0))

    # VMEM budget from the real footprint: 2 inputs x 2 pipeline buffers,
    # f32 temporaries (diff / shifted / weighted |grad|), lane-padded mask
    # blocks, tiny accumulator, slack.  Clamped for v7x's 64 MiB VMEM.
    in_bytes = TR * W * prediction.dtype.itemsize
    f32_bytes = TR * W * 4
    mask_bytes = (2 * 2 * S * TR * 128 * 4 + 2 * 2 * S * 8 * max(W, 128) * 4) if S else 0
    vmem_need = 2 * 2 * in_bytes + 6 * f32_bytes + mask_bytes + (2 << 20)
    vmem_limit = int(min(max(vmem_need, 32 << 20), 56 << 20))

    out = pl.pallas_call(
        kernel,
        out_shape=out_shape,
        grid=(P, nblk_pp),
        in_specs=in_specs,
        out_specs=out_specs,
        compiler_params=pltpu.CompilerParams(
            dimension_semantics=("parallel", "arbitrary"),
            vmem_limit_bytes=vmem_limit,
        ),
    )(*args)

    # every element of band i holds that band's accumulated partial; pick one
    nums = out[:, ::8, 0].sum(axis=0)                       # (n_out,)

    # All-ones mask => static positive divisors (divisor==0 branch unreachable).
    total = nums[0] / jnp.float32(2 * B * H * W)
    if S > 0:
        h, w = H, W
        for s in range(S):
            total = total + alpha * (nums[1 + s] / jnp.float32(B * h * w))
            h, w = -(-h // 2), -(-w // 2)                   # ceil-halving matches x[::2]
    return total


# ---------------------------------------------------------------------------
# Pure-JAX reference (mirrors the PyTorch code) for a correctness check
# ---------------------------------------------------------------------------
def _ref_depth_loss(prediction, target, alpha=0.5, scales=4):
    mask = jnp.ones_like(prediction)

    def red(image_loss, M):
        div = jnp.sum(M)
        return jnp.where(div == 0, 0.0, jnp.sum(image_loss) / jnp.where(div == 0, 1.0, div))

    def mse(p, t, m):
        M = jnp.sum(m, (1, 2))
        res = p - t
        il = jnp.sum(m * res * res, (1, 2))
        return red(il, 2 * M)

    def grad(p, t, m):
        M = jnp.sum(m, (1, 2))
        d = m * (p - t)
        gx = jnp.abs(d[:, :, 1:] - d[:, :, :-1]) * (m[:, :, 1:] * m[:, :, :-1])
        gy = jnp.abs(d[:, 1:, :] - d[:, :-1, :]) * (m[:, 1:, :] * m[:, :-1, :])
        il = jnp.sum(gx, (1, 2)) + jnp.sum(gy, (1, 2))
        return red(il, M)

    total = mse(prediction, target, mask)
    if alpha > 0:
        for s in range(scales):
            step = 2 ** s
            total += alpha * grad(prediction[:, ::step, ::step],
                                  target[:, ::step, ::step],
                                  mask[:, ::step, ::step])
    return total


# ---------------------------------------------------------------------------
if __name__ == "__main__":
    key = jax.random.PRNGKey(0)
    k1, k2 = jax.random.split(key)
    B, H, W = 2, 16, 16
    prediction = jax.random.normal(k1, (B, H, W), dtype=jnp.float32)
    target = jax.random.normal(k2, (B, H, W), dtype=jnp.float32)

    out = depth_loss(prediction, target, alpha=0.5, scales=4)
    out = jax.block_until_ready(out)

    ref = _ref_depth_loss(prediction, target, alpha=0.5, scales=4)
    assert jnp.allclose(out, ref, rtol=1e-4, atol=1e-5), (out, ref)

    print("KERNEL_OK")
</pallas_src>

<mosaic_0001>
module attributes {stable_mosaic.version = 11 : i64} {
  func.func @_depth_loss_kernel(%arg0: i32, %arg1: i32, %arg2: memref<32x16xf32, #tpu.memory_space<vmem>>, %arg3: memref<32x16xf32, #tpu.memory_space<vmem>>, %arg4: memref<4x32x1xf32, #tpu.memory_space<vmem>>, %arg5: memref<4x32x1xf32, #tpu.memory_space<vmem>>, %arg6: memref<4x1x16xf32, #tpu.memory_space<vmem>>, %arg7: memref<4x1x16xf32, #tpu.memory_space<vmem>>, %arg8: memref<1x40x128xf32, #tpu.memory_space<vmem>>) attributes {dimension_semantics = [#tpu.dimension_semantics<parallel>, #tpu.dimension_semantics<arbitrary>], iteration_bounds = array<i64: 1, 1>, scalar_prefetch = 0 : i64, scratch_operands = 0 : i64, tpu.core_type = #tpu.core_type<tc>, window_params = [{transform_indices = @transform_0, window_bounds = array<i64: 32, 16>}, {transform_indices = @transform_1, window_bounds = array<i64: 32, 16>}, {pipeline_mode = #tpu.pipeline_mode<synchronous>, transform_indices = @transform_2, window_bounds = array<i64: 4, 32, 1>}, {pipeline_mode = #tpu.pipeline_mode<synchronous>, transform_indices = @transform_3, window_bounds = array<i64: 4, 32, 1>}, {pipeline_mode = #tpu.pipeline_mode<synchronous>, transform_indices = @transform_4, window_bounds = array<i64: 4, 1, 16>}, {pipeline_mode = #tpu.pipeline_mode<synchronous>, transform_indices = @transform_5, window_bounds = array<i64: 4, 1, 16>}, {transform_indices = @transform_6, window_bounds = array<i64: 1, 40, 128>}]} {
    %c0_i32 = arith.constant 0 : i32
    %0 = arith.cmpi eq, %arg1, %c0_i32 : i32
    %1 = arith.extui %0 : i1 to i32
    %c0_i32_0 = arith.constant 0 : i32
    %2 = arith.cmpi ne, %1, %c0_i32_0 : i32
    scf.if %2 {
      %cst_87 = arith.constant 0.000000e+00 : f32
      %190 = vector.broadcast %cst_87 : f32 to vector<1x40x128xf32>
      %c0_88 = arith.constant 0 : index
      %c0_89 = arith.constant 0 : index
      %c0_90 = arith.constant 0 : index
      %191 = vector.load %arg8[%c0_88, %c0_89, %c0_90] : memref<1x40x128xf32, #tpu.memory_space<vmem>>, vector<1x40x128xf32>
      tpu.vector_store %arg8[%c0_88, %c0_89, %c0_90], %190 {strides = array<i32>} : memref<1x40x128xf32, #tpu.memory_space<vmem>>, vector<1x40x128xf32>,
    } else {
    }
    %c0 = arith.constant 0 : index
    %c0_1 = arith.constant 0 : index
    %3 = vector.load %arg2[%c0, %c0_1] : memref<32x16xf32, #tpu.memory_space<vmem>>, vector<32x16xf32>
    %c0_2 = arith.constant 0 : index
    %c0_3 = arith.constant 0 : index
    %4 = vector.load %arg3[%c0_2, %c0_3] : memref<32x16xf32, #tpu.memory_space<vmem>>, vector<32x16xf32>
    %5 = arith.subf %3, %4 : vector<32x16xf32>
    %6 = arith.mulf %5, %5 : vector<32x16xf32>
    %7 = vector.shape_cast %6 : vector<32x16xf32> to vector<1x32x16xf32>
    %cst = arith.constant dense<0.000000e+00> : vector<1xf32>
    %8 = vector.multi_reduction <add>, %7, %cst [1, 2] : vector<1x32x16xf32> to vector<1xf32>
    %9 = vector.shape_cast %8 : vector<1xf32> to vector<1x1x1xf32>
    %10 = vector.extract %9[0, 0, 0] : f32 from vector<1x1x1xf32>
    %c0_4 = arith.constant 0 : index
    %c0_5 = arith.constant 0 : index
    %c0_6 = arith.constant 0 : index
    %11 = vector.load %arg8[%c0_4, %c0_5, %c0_6] : memref<1x40x128xf32, #tpu.memory_space<vmem>>, vector<1x8x128xf32>
    %12 = vector.shape_cast %11 : vector<1x8x128xf32> to vector<8x128xf32>
    %13 = vector.broadcast %10 : f32 to vector<8x128xf32>
    %14 = arith.addf %12, %13 : vector<8x128xf32>
    %c0_7 = arith.constant 0 : index
    %c0_8 = arith.constant 0 : index
    %c0_9 = arith.constant 0 : index
    %15 = vector.load %arg8[%c0_7, %c0_8, %c0_9] : memref<1x40x128xf32, #tpu.memory_space<vmem>>, vector<1x8x128xf32>
    %16 = vector.shape_cast %15 : vector<1x8x128xf32> to vector<8x128xf32>
    %17 = vector.shape_cast %14 : vector<8x128xf32> to vector<1x8x128xf32>
    tpu.vector_store %arg8[%c0_7, %c0_8, %c0_9], %17 {strides = array<i32>} : memref<1x40x128xf32, #tpu.memory_space<vmem>>, vector<1x8x128xf32>,
    %c0_10 = arith.constant 0 : index
    %c0_11 = arith.constant 0 : index
    %c0_12 = arith.constant 0 : index
    %18 = vector.load %arg4[%c0_10, %c0_11, %c0_12] : memref<4x32x1xf32, #tpu.memory_space<vmem>>, vector<1x32x1xf32>
    %19 = vector.shape_cast %18 : vector<1x32x1xf32> to vector<32x1xf32>
    %c0_13 = arith.constant 0 : index
    %c0_14 = arith.constant 0 : index
    %c0_15 = arith.constant 0 : index
    %20 = vector.load %arg7[%c0_13, %c0_14, %c0_15] : memref<4x1x16xf32, #tpu.memory_space<vmem>>, vector<1x1x16xf32>
    %21 = vector.shape_cast %20 : vector<1x1x16xf32> to vector<1x16xf32>
    %22 = vector.extract_strided_slice %5 {offsets = [0, 1], sizes = [32, 15], strides = [1, 1]} : vector<32x16xf32> to vector<32x15xf32>
    %23 = vector.extract_strided_slice %5 {offsets = [0, 0], sizes = [32, 15], strides = [1, 1]} : vector<32x16xf32> to vector<32x15xf32>
    %24 = arith.subf %22, %23 : vector<32x15xf32>
    %25 = math.absf %24 : vector<32x15xf32>
    %26 = vector.broadcast %19 : vector<32x1xf32> to vector<32x15xf32>
    %27 = arith.mulf %25, %26 : vector<32x15xf32>
    %28 = vector.extract_strided_slice %21 {offsets = [0, 0], sizes = [1, 15], strides = [1, 1]} : vector<1x16xf32> to vector<1x15xf32>
    %29 = vector.broadcast %28 : vector<1x15xf32> to vector<32x15xf32>
    %30 = arith.mulf %27, %29 : vector<32x15xf32>
    %31 = vector.shape_cast %30 : vector<32x15xf32> to vector<1x32x15xf32>
    %cst_16 = arith.constant dense<0.000000e+00> : vector<1xf32>
    %32 = vector.multi_reduction <add>, %31, %cst_16 [1, 2] : vector<1x32x15xf32> to vector<1xf32>
    %33 = vector.shape_cast %32 : vector<1xf32> to vector<1x1x1xf32>
    %34 = vector.extract %33[0, 0, 0] : f32 from vector<1x1x1xf32>
    %cst_17 = arith.constant 0.000000e+00 : f32
    %35 = arith.addf %cst_17, %34 : f32
    %c0_18 = arith.constant 0 : index
    %c0_19 = arith.constant 0 : index
    %c0_20 = arith.constant 0 : index
    %36 = vector.load %arg5[%c0_18, %c0_19, %c0_20] : memref<4x32x1xf32, #tpu.memory_space<vmem>>, vector<1x32x1xf32>
    %37 = vector.shape_cast %36 : vector<1x32x1xf32> to vector<32x1xf32>
    %c0_21 = arith.constant 0 : index
    %c0_22 = arith.constant 0 : index
    %c0_23 = arith.constant 0 : index
    %38 = vector.load %arg6[%c0_21, %c0_22, %c0_23] : memref<4x1x16xf32, #tpu.memory_space<vmem>>, vector<1x1x16xf32>
    %39 = vector.shape_cast %38 : vector<1x1x16xf32> to vector<1x16xf32>
    %40 = vector.extract_strided_slice %5 {offsets = [1, 0], sizes = [31, 16], strides = [1, 1]} : vector<32x16xf32> to vector<31x16xf32>
    %41 = vector.extract_strided_slice %5 {offsets = [0, 0], sizes = [31, 16], strides = [1, 1]} : vector<32x16xf32> to vector<31x16xf32>
    %42 = arith.subf %40, %41 : vector<31x16xf32>
    %43 = math.absf %42 : vector<31x16xf32>
    %44 = vector.extract_strided_slice %37 {offsets = [0, 0], sizes = [31, 1], strides = [1, 1]} : vector<32x1xf32> to vector<31x1xf32>
    %45 = vector.broadcast %44 : vector<31x1xf32> to vector<31x16xf32>
    %46 = arith.mulf %43, %45 : vector<31x16xf32>
    %47 = vector.broadcast %39 : vector<1x16xf32> to vector<31x16xf32>
    %48 = arith.mulf %46, %47 : vector<31x16xf32>
    %49 = vector.shape_cast %48 : vector<31x16xf32> to vector<1x31x16xf32>
    %cst_24 = arith.constant dense<0.000000e+00> : vector<1xf32>
    %50 = vector.multi_reduction <add>, %49, %cst_24 [1, 2] : vector<1x31x16xf32> to vector<1xf32>
    %51 = vector.shape_cast %50 : vector<1xf32> to vector<1x1x1xf32>
    %52 = vector.extract %51[0, 0, 0] : f32 from vector<1x1x1xf32>
    %53 = arith.addf %35, %52 : f32
    %c0_25 = arith.constant 0 : index
    %c8 = arith.constant 8 : index
    %c0_26 = arith.constant 0 : index
    %54 = vector.load %arg8[%c0_25, %c8, %c0_26] : memref<1x40x128xf32, #tpu.memory_space<vmem>>, vector<1x8x128xf32>
    %55 = vector.shape_cast %54 : vector<1x8x128xf32> to vector<8x128xf32>
    %56 = vector.broadcast %53 : f32 to vector<8x128xf32>
    %57 = arith.addf %55, %56 : vector<8x128xf32>
    %c0_27 = arith.constant 0 : index
    %c8_28 = arith.constant 8 : index
    %c0_29 = arith.constant 0 : index
    %58 = vector.load %arg8[%c0_27, %c8_28, %c0_29] : memref<1x40x128xf32, #tpu.memory_space<vmem>>, vector<1x8x128xf32>
    %59 = vector.shape_cast %58 : vector<1x8x128xf32> to vector<8x128xf32>
    %60 = vector.shape_cast %57 : vector<8x128xf32> to vector<1x8x128xf32>
    tpu.vector_store %arg8[%c0_27, %c8_28, %c0_29], %60 {strides = array<i32>} : memref<1x40x128xf32, #tpu.memory_space<vmem>>, vector<1x8x128xf32>,
    %c1 = arith.constant 1 : index
    %c0_30 = arith.constant 0 : index
    %c0_31 = arith.constant 0 : index
    %61 = vector.load %arg4[%c1, %c0_30, %c0_31] : memref<4x32x1xf32, #tpu.memory_space<vmem>>, vector<1x32x1xf32>
    %62 = vector.shape_cast %61 : vector<1x32x1xf32> to vector<32x1xf32>
    %c1_32 = arith.constant 1 : index
    %c0_33 = arith.constant 0 : index
    %c0_34 = arith.constant 0 : index
    %63 = vector.load %arg7[%c1_32, %c0_33, %c0_34] : memref<4x1x16xf32, #tpu.memory_space<vmem>>, vector<1x1x16xf32>
    %64 = vector.shape_cast %63 : vector<1x1x16xf32> to vector<1x16xf32>
    %65 = vector.extract_strided_slice %5 {offsets = [0, 2], sizes = [32, 14], strides = [1, 1]} : vector<32x16xf32> to vector<32x14xf32>
    %66 = vector.extract_strided_slice %5 {offsets = [0, 0], sizes = [32, 14], strides = [1, 1]} : vector<32x16xf32> to vector<32x14xf32>
    %67 = arith.subf %65, %66 : vector<32x14xf32>
    %68 = math.absf %67 : vector<32x14xf32>
    %69 = vector.broadcast %62 : vector<32x1xf32> to vector<32x14xf32>
    %70 = arith.mulf %68, %69 : vector<32x14xf32>
    %71 = vector.extract_strided_slice %64 {offsets = [0, 0], sizes = [1, 14], strides = [1, 1]} : vector<1x16xf32> to vector<1x14xf32>
    %72 = vector.broadcast %71 : vector<1x14xf32> to vector<32x14xf32>
    %73 = arith.mulf %70, %72 : vector<32x14xf32>
    %74 = vector.shape_cast %73 : vector<32x14xf32> to vector<1x32x14xf32>
    %cst_35 = arith.constant dense<0.000000e+00> : vector<1xf32>
    %75 = vector.multi_reduction <add>, %74, %cst_35 [1, 2] : vector<1x32x14xf32> to vector<1xf32>
    %76 = vector.shape_cast %75 : vector<1xf32> to vector<1x1x1xf32>
    %77 = vector.extract %76[0, 0, 0] : f32 from vector<1x1x1xf32>
    %cst_36 = arith.constant 0.000000e+00 : f32
    %78 = arith.addf %cst_36, %77 : f32
    %c1_37 = arith.constant 1 : index
    %c0_38 = arith.constant 0 : index
    %c0_39 = arith.constant 0 : index
    %79 = vector.load %arg5[%c1_37, %c0_38, %c0_39] : memref<4x32x1xf32, #tpu.memory_space<vmem>>, vector<1x32x1xf32>
    %80 = vector.shape_cast %79 : vector<1x32x1xf32> to vector<32x1xf32>
    %c1_40 = arith.constant 1 : index
    %c0_41 = arith.constant 0 : index
    %c0_42 = arith.constant 0 : index
    %81 = vector.load %arg6[%c1_40, %c0_41, %c0_42] : memref<4x1x16xf32, #tpu.memory_space<vmem>>, vector<1x1x16xf32>
    %82 = vector.shape_cast %81 : vector<1x1x16xf32> to vector<1x16xf32>
    %83 = vector.extract_strided_slice %5 {offsets = [2, 0], sizes = [30, 16], strides = [1, 1]} : vector<32x16xf32> to vector<30x16xf32>
    %84 = vector.extract_strided_slice %5 {offsets = [0, 0], sizes = [30, 16], strides = [1, 1]} : vector<32x16xf32> to vector<30x16xf32>
    %85 = arith.subf %83, %84 : vector<30x16xf32>
    %86 = math.absf %85 : vector<30x16xf32>
    %87 = vector.extract_strided_slice %80 {offsets = [0, 0], sizes = [30, 1], strides = [1, 1]} : vector<32x1xf32> to vector<30x1xf32>
    %88 = vector.broadcast %87 : vector<30x1xf32> to vector<30x16xf32>
    %89 = arith.mulf %86, %88 : vector<30x16xf32>
    %90 = vector.broadcast %82 : vector<1x16xf32> to vector<30x16xf32>
    %91 = arith.mulf %89, %90 : vector<30x16xf32>
    %92 = vector.shape_cast %91 : vector<30x16xf32> to vector<1x30x16xf32>
    %cst_43 = arith.constant dense<0.000000e+00> : vector<1xf32>
    %93 = vector.multi_reduction <add>, %92, %cst_43 [1, 2] : vector<1x30x16xf32> to vector<1xf32>
    %94 = vector.shape_cast %93 : vector<1xf32> to vector<1x1x1xf32>
    %95 = vector.extract %94[0, 0, 0] : f32 from vector<1x1x1xf32>
    %96 = arith.addf %78, %95 : f32
    %c0_44 = arith.constant 0 : index
    %c16 = arith.constant 16 : index
    %c0_45 = arith.constant 0 : index
    %97 = vector.load %arg8[%c0_44, %c16, %c0_45] : memref<1x40x128xf32, #tpu.memory_space<vmem>>, vector<1x8x128xf32>
    %98 = vector.shape_cast %97 : vector<1x8x128xf32> to vector<8x128xf32>
    %99 = vector.broadcast %96 : f32 to vector<8x128xf32>
    %100 = arith.addf %98, %99 : vector<8x128xf32>
    %c0_46 = arith.constant 0 : index
    %c16_47 = arith.constant 16 : index
    %c0_48 = arith.constant 0 : index
    %101 = vector.load %arg8[%c0_46, %c16_47, %c0_48] : memref<1x40x128xf32, #tpu.memory_space<vmem>>, vector<1x8x128xf32>
    %102 = vector.shape_cast %101 : vector<1x8x128xf32> to vector<8x128xf32>
    %103 = vector.shape_cast %100 : vector<8x128xf32> to vector<1x8x128xf32>
    tpu.vector_store %arg8[%c0_46, %c16_47, %c0_48], %103 {strides = array<i32>} : memref<1x40x128xf32, #tpu.memory_space<vmem>>, vector<1x8x128xf32>,
    %c2 = arith.constant 2 : index
    %c0_49 = arith.constant 0 : index
    %c0_50 = arith.constant 0 : index
    %104 = vector.load %arg4[%c2, %c0_49, %c0_50] : memref<4x32x1xf32, #tpu.memory_space<vmem>>, vector<1x32x1xf32>
    %105 = vector.shape_cast %104 : vector<1x32x1xf32> to vector<32x1xf32>
    %c2_51 = arith.constant 2 : index
    %c0_52 = arith.constant 0 : index
    %c0_53 = arith.constant 0 : index
    %106 = vector.load %arg7[%c2_51, %c0_52, %c0_53] : memref<4x1x16xf32, #tpu.memory_space<vmem>>, vector<1x1x16xf32>
    %107 = vector.shape_cast %106 : vector<1x1x16xf32> to vector<1x16xf32>
    %108 = vector.extract_strided_slice %5 {offsets = [0, 4], sizes = [32, 12], strides = [1, 1]} : vector<32x16xf32> to vector<32x12xf32>
    %109 = vector.extract_strided_slice %5 {offsets = [0, 0], sizes = [32, 12], strides = [1, 1]} : vector<32x16xf32> to vector<32x12xf32>
    %110 = arith.subf %108, %109 : vector<32x12xf32>
    %111 = math.absf %110 : vector<32x12xf32>
    %112 = vector.broadcast %105 : vector<32x1xf32> to vector<32x12xf32>
    %113 = arith.mulf %111, %112 : vector<32x12xf32>
    %114 = vector.extract_strided_slice %107 {offsets = [0, 0], sizes = [1, 12], strides = [1, 1]} : vector<1x16xf32> to vector<1x12xf32>
    %115 = vector.broadcast %114 : vector<1x12xf32> to vector<32x12xf32>
    %116 = arith.mulf %113, %115 : vector<32x12xf32>
    %117 = vector.shape_cast %116 : vector<32x12xf32> to vector<1x32x12xf32>
    %cst_54 = arith.constant dense<0.000000e+00> : vector<1xf32>
    %118 = vector.multi_reduction <add>, %117, %cst_54 [1, 2] : vector<1x32x12xf32> to vector<1xf32>
    %119 = vector.shape_cast %118 : vector<1xf32> to vector<1x1x1xf32>
    %120 = vector.extract %119[0, 0, 0] : f32 from vector<1x1x1xf32>
    %cst_55 = arith.constant 0.000000e+00 : f32
    %121 = arith.addf %cst_55, %120 : f32
    %c2_56 = arith.constant 2 : index
    %c0_57 = arith.constant 0 : index
    %c0_58 = arith.constant 0 : index
    %122 = vector.load %arg5[%c2_56, %c0_57, %c0_58] : memref<4x32x1xf32, #tpu.memory_space<vmem>>, vector<1x32x1xf32>
    %123 = vector.shape_cast %122 : vector<1x32x1xf32> to vector<32x1xf32>
    %c2_59 = arith.constant 2 : index
    %c0_60 = arith.constant 0 : index
    %c0_61 = arith.constant 0 : index
    %124 = vector.load %arg6[%c2_59, %c0_60, %c0_61] : memref<4x1x16xf32, #tpu.memory_space<vmem>>, vector<1x1x16xf32>
    %125 = vector.shape_cast %124 : vector<1x1x16xf32> to vector<1x16xf32>
    %126 = vector.extract_strided_slice %5 {offsets = [4, 0], sizes = [28, 16], strides = [1, 1]} : vector<32x16xf32> to vector<28x16xf32>
    %127 = vector.extract_strided_slice %5 {offsets = [0, 0], sizes = [28, 16], strides = [1, 1]} : vector<32x16xf32> to vector<28x16xf32>
    %128 = arith.subf %126, %127 : vector<28x16xf32>
    %129 = math.absf %128 : vector<28x16xf32>
    %130 = vector.extract_strided_slice %123 {offsets = [0, 0], sizes = [28, 1], strides = [1, 1]} : vector<32x1xf32> to vector<28x1xf32>
    %131 = vector.broadcast %130 : vector<28x1xf32> to vector<28x16xf32>
    %132 = arith.mulf %129, %131 : vector<28x16xf32>
    %133 = vector.broadcast %125 : vector<1x16xf32> to vector<28x16xf32>
    %134 = arith.mulf %132, %133 : vector<28x16xf32>
    %135 = vector.shape_cast %134 : vector<28x16xf32> to vector<1x28x16xf32>
    %cst_62 = arith.constant dense<0.000000e+00> : vector<1xf32>
    %136 = vector.multi_reduction <add>, %135, %cst_62 [1, 2] : vector<1x28x16xf32> to vector<1xf32>
    %137 = vector.shape_cast %136 : vector<1xf32> to vector<1x1x1xf32>
    %138 = vector.extract %137[0, 0, 0] : f32 from vector<1x1x1xf32>
    %139 = arith.addf %121, %138 : f32
    %c0_63 = arith.constant 0 : index
    %c24 = arith.constant 24 : index
    %c0_64 = arith.constant 0 : index
    %140 = vector.load %arg8[%c0_63, %c24, %c0_64] : memref<1x40x128xf32, #tpu.memory_space<vmem>>, vector<1x8x128xf32>
    %141 = vector.shape_cast %140 : vector<1x8x128xf32> to vector<8x128xf32>
    %142 = vector.broadcast %139 : f32 to vector<8x128xf32>
    %143 = arith.addf %141, %142 : vector<8x128xf32>
    %c0_65 = arith.constant 0 : index
    %c24_66 = arith.constant 24 : index
    %c0_67 = arith.constant 0 : index
    %144 = vector.load %arg8[%c0_65, %c24_66, %c0_67] : memref<1x40x128xf32, #tpu.memory_space<vmem>>, vector<1x8x128xf32>
    %145 = vector.shape_cast %144 : vector<1x8x128xf32> to vector<8x128xf32>
    %146 = vector.shape_cast %143 : vector<8x128xf32> to vector<1x8x128xf32>
    tpu.vector_store %arg8[%c0_65, %c24_66, %c0_67], %146 {strides = array<i32>} : memref<1x40x128xf32, #tpu.memory_space<vmem>>, vector<1x8x128xf32>,
    %c3 = arith.constant 3 : index
    %c0_68 = arith.constant 0 : index
    %c0_69 = arith.constant 0 : index
    %147 = vector.load %arg4[%c3, %c0_68, %c0_69] : memref<4x32x1xf32, #tpu.memory_space<vmem>>, vector<1x32x1xf32>
    %148 = vector.shape_cast %147 : vector<1x32x1xf32> to vector<32x1xf32>
    %c3_70 = arith.constant 3 : index
    %c0_71 = arith.constant 0 : index
    %c0_72 = arith.constant 0 : index
    %149 = vector.load %arg7[%c3_70, %c0_71, %c0_72] : memref<4x1x16xf32, #tpu.memory_space<vmem>>, vector<1x1x16xf32>
    %150 = vector.shape_cast %149 : vector<1x1x16xf32> to vector<1x16xf32>
    %151 = vector.extract_strided_slice %5 {offsets = [0, 8], sizes = [32, 8], strides = [1, 1]} : vector<32x16xf32> to vector<32x8xf32>
    %152 = vector.extract_strided_slice %5 {offsets = [0, 0], sizes = [32, 8], strides = [1, 1]} : vector<32x16xf32> to vector<32x8xf32>
    %153 = arith.subf %151, %152 : vector<32x8xf32>
    %154 = math.absf %153 : vector<32x8xf32>
    %155 = vector.broadcast %148 : vector<32x1xf32> to vector<32x8xf32>
    %156 = arith.mulf %154, %155 : vector<32x8xf32>
    %157 = vector.extract_strided_slice %150 {offsets = [0, 0], sizes = [1, 8], strides = [1, 1]} : vector<1x16xf32> to vector<1x8xf32>
    %158 = vector.broadcast %157 : vector<1x8xf32> to vector<32x8xf32>
    %159 = arith.mulf %156, %158 : vector<32x8xf32>
    %160 = vector.shape_cast %159 : vector<32x8xf32> to vector<1x32x8xf32>
    %cst_73 = arith.constant dense<0.000000e+00> : vector<1xf32>
    %161 = vector.multi_reduction <add>, %160, %cst_73 [1, 2] : vector<1x32x8xf32> to vector<1xf32>
    %162 = vector.shape_cast %161 : vector<1xf32> to vector<1x1x1xf32>
    %163 = vector.extract %162[0, 0, 0] : f32 from vector<1x1x1xf32>
    %cst_74 = arith.constant 0.000000e+00 : f32
    %164 = arith.addf %cst_74, %163 : f32
    %c3_75 = arith.constant 3 : index
    %c0_76 = arith.constant 0 : index
    %c0_77 = arith.constant 0 : index
    %165 = vector.load %arg5[%c3_75, %c0_76, %c0_77] : memref<4x32x1xf32, #tpu.memory_space<vmem>>, vector<1x32x1xf32>
    %166 = vector.shape_cast %165 : vector<1x32x1xf32> to vector<32x1xf32>
    %c3_78 = arith.constant 3 : index
    %c0_79 = arith.constant 0 : index
    %c0_80 = arith.constant 0 : index
    %167 = vector.load %arg6[%c3_78, %c0_79, %c0_80] : memref<4x1x16xf32, #tpu.memory_space<vmem>>, vector<1x1x16xf32>
    %168 = vector.shape_cast %167 : vector<1x1x16xf32> to vector<1x16xf32>
    %169 = vector.extract_strided_slice %5 {offsets = [8, 0], sizes = [24, 16], strides = [1, 1]} : vector<32x16xf32> to vector<24x16xf32>
    %170 = vector.extract_strided_slice %5 {offsets = [0, 0], sizes = [24, 16], strides = [1, 1]} : vector<32x16xf32> to vector<24x16xf32>
    %171 = arith.subf %169, %170 : vector<24x16xf32>
    %172 = math.absf %171 : vector<24x16xf32>
    %173 = vector.extract_strided_slice %166 {offsets = [0, 0], sizes = [24, 1], strides = [1, 1]} : vector<32x1xf32> to vector<24x1xf32>
    %174 = vector.broadcast %173 : vector<24x1xf32> to vector<24x16xf32>
    %175 = arith.mulf %172, %174 : vector<24x16xf32>
    %176 = vector.broadcast %168 : vector<1x16xf32> to vector<24x16xf32>
    %177 = arith.mulf %175, %176 : vector<24x16xf32>
    %178 = vector.shape_cast %177 : vector<24x16xf32> to vector<1x24x16xf32>
    %cst_81 = arith.constant dense<0.000000e+00> : vector<1xf32>
    %179 = vector.multi_reduction <add>, %178, %cst_81 [1, 2] : vector<1x24x16xf32> to vector<1xf32>
    %180 = vector.shape_cast %179 : vector<1xf32> to vector<1x1x1xf32>
    %181 = vector.extract %180[0, 0, 0] : f32 from vector<1x1x1xf32>
    %182 = arith.addf %164, %181 : f32
    %c0_82 = arith.constant 0 : index
    %c32 = arith.constant 32 : index
    %c0_83 = arith.constant 0 : index
    %183 = vector.load %arg8[%c0_82, %c32, %c0_83] : memref<1x40x128xf32, #tpu.memory_space<vmem>>, vector<1x8x128xf32>
    %184 = vector.shape_cast %183 : vector<1x8x128xf32> to vector<8x128xf32>
    %185 = vector.broadcast %182 : f32 to vector<8x128xf32>
    %186 = arith.addf %184, %185 : vector<8x128xf32>
    %c0_84 = arith.constant 0 : index
    %c32_85 = arith.constant 32 : index
    %c0_86 = arith.constant 0 : index
    %187 = vector.load %arg8[%c0_84, %c32_85, %c0_86] : memref<1x40x128xf32, #tpu.memory_space<vmem>>, vector<1x8x128xf32>
    %188 = vector.shape_cast %187 : vector<1x8x128xf32> to vector<8x128xf32>
    %189 = vector.shape_cast %186 : vector<8x128xf32> to vector<1x8x128xf32>
    tpu.vector_store %arg8[%c0_84, %c32_85, %c0_86], %189 {strides = array<i32>} : memref<1x40x128xf32, #tpu.memory_space<vmem>>, vector<1x8x128xf32>,
    return
  }
  func.func @transform_0(%arg0: i32, %arg1: i32) -> (i32, i32) {
    %c1_i32 = arith.constant 1 : i32
    %0 = arith.muli %arg0, %c1_i32 : i32
    %1 = arith.addi %0, %arg1 : i32
    %c0_i32 = arith.constant 0 : i32
    %c0_i32_0 = arith.constant 0 : i32
    return %1, %c0_i32 : i32, i32
  }
  func.func @transform_1(%arg0: i32, %arg1: i32) -> (i32, i32) {
    %c1_i32 = arith.constant 1 : i32
    %0 = arith.muli %arg0, %c1_i32 : i32
    %1 = arith.addi %0, %arg1 : i32
    %c0_i32 = arith.constant 0 : i32
    %c0_i32_0 = arith.constant 0 : i32
    return %1, %c0_i32 : i32, i32
  }
  func.func @transform_2(%arg0: i32, %arg1: i32) -> (i32, i32, i32) {
    %c0_i32 = arith.constant 0 : i32
    %c0_i32_0 = arith.constant 0 : i32
    %c0_i32_1 = arith.constant 0 : i32
    %c0_i32_2 = arith.constant 0 : i32
    return %c0_i32, %c0_i32_0, %c0_i32_1 : i32, i32, i32
  }
  func.func @transform_3(%arg0: i32, %arg1: i32) -> (i32, i32, i32) {
    %c0_i32 = arith.constant 0 : i32
    %c0_i32_0 = arith.constant 0 : i32
    %c0_i32_1 = arith.constant 0 : i32
    %c0_i32_2 = arith.constant 0 : i32
    return %c0_i32, %c0_i32_0, %c0_i32_1 : i32, i32, i32
  }
  func.func @transform_4(%arg0: i32, %arg1: i32) -> (i32, i32, i32) {
    %c0_i32 = arith.constant 0 : i32
    %c0_i32_0 = arith.constant 0 : i32
    %c0_i32_1 = arith.constant 0 : i32
    %c0_i32_2 = arith.constant 0 : i32
    return %c0_i32, %c0_i32_0, %c0_i32_1 : i32, i32, i32
  }
  func.func @transform_5(%arg0: i32, %arg1: i32) -> (i32, i32, i32) {
    %c0_i32 = arith.constant 0 : i32
    %c0_i32_0 = arith.constant 0 : i32
    %c0_i32_1 = arith.constant 0 : i32
    %c0_i32_2 = arith.constant 0 : i32
    return %c0_i32, %c0_i32_0, %c0_i32_1 : i32, i32, i32
  }
  func.func @transform_6(%arg0: i32, %arg1: i32) -> (i32, i32, i32) {
    %c0_i32 = arith.constant 0 : i32
    %c0_i32_0 = arith.constant 0 : i32
    %c0_i32_1 = arith.constant 0 : i32
    return %arg0, %c0_i32, %c0_i32_0 : i32, i32, i32
  }
}

</mosaic_0001>

<bundles_post_ra>
// kernel: depth_loss.1
= control target key start
LH: loop header
LB: loop body
LE: loop exit
PB: predicated region body
PF: predicated region fallthrough
CT: control target
= control target key end

     0   :  { %11 = vsyncpa [#allocation3], 0  ;;  %s1397_s0 = inlined_call_operand.hbm [shape: f32[32,16], index: 0, kind: input, shape index: {}]   ;;  %s1398_s1 = inlined_call_operand.hbm [shape: f32[32,16], index: 1, kind: input, shape index: {}]   ;;  %s1399_s2 = inlined_call_operand.hbm [shape: f32[4,32,1], index: 2, kind: input, shape index: {}]   ;;  %s1400_s3 = inlined_call_operand.hbm [shape: f32[4,32,1], index: 3, kind: input, shape index: {}]   ;;  %s1401_s4 = inlined_call_operand.vmem [shape: f32[4,1,16], index: 4, kind: input, shape index: {}]   ;;  %s1402_s5 = inlined_call_operand.vmem [shape: f32[4,1,16], index: 5, kind: input, shape index: {}]   ;;  %s1403_s6 = inlined_call_operand.vmem [shape: f32[1,40,128], index: 6, kind: output, shape index: {}]  }
   0x1   :  { %12 = vsyncpa [#allocation5], 0 }
   0x2   :  { %13 = vsyncpa [#allocation8], 0  ;;  %s1049_s21 = smov [#allocation4]   ;;  %s1050_s23 = smov [#allocation2]  }
   0x3   :  { %s39_s22 = sshll.u32 %s1049_s21, 4  ;;  %s23_s24 = sshll.u32 %s1050_s23, 4  ;;  %s40_s22 = int_to_ptr.vmem [resolvable:$true] %s39_s22  ;;  %s1098_s24 = int_to_ptr.vmem [resolvable:$true] %s23_s24 }
   0x4   :  { %s955_s27 = scalar_lea.hbm %s1398_s1, 512 }
   0x5   :  { %p956_p0 = scmp.ne.s32.totalorder %s1398_s1, %s955_s27  ;;  %p959_p1 = scmp.lt.u32.totalorder %s955_s27, %s1398_s1 }
   0x7   :  { %p961_p2 = pnand %p959_p1, %p956_p0 }
   0x9   :  { %964 = shalt.err (!%p961_p2)
}
   0xa   :  { %s965_s8 = scalar_lea.vmem %s40_s22, 512  ;;  %p970_p4 = scmp.lt.s32.totalorder %s40_s22, %s40_s22 }
   0xb   :  { %p966_p3 = scmp.ne.s32.totalorder %s40_s22, %s965_s8  ;;  %p971_p5 = scmp.lt.s32.totalorder %s965_s8, %s965_s8 }
   0xd   :  { %p972_p6 = por %p971_p5, %p970_p4 }
   0xf   :  { %p973_p7 = pnand %p972_p6, %p966_p3 }
  0x11   :  { %976 = shalt.err (!%p973_p7)
}
  0x12   :  { %s1051_s9 = smov 128   ;;  %s1052_s10 = smov 8  }
  0x13   :  { %45 = dma.hbm_to_vmem [thread:$0]  %s1398_s1, 512, %s40_s22, [#allocation5], %s1051_s9, %s1051_s9, %s1052_s10  }
  0x14   :  { %s977_s15 = scalar_lea.hbm %s1397_s0, 512 }
  0x15   :  { %p978_p8 = scmp.ne.s32.totalorder %s1397_s0, %s977_s15  ;;  %p981_p9 = scmp.lt.u32.totalorder %s977_s15, %s1397_s0 }
  0x17   :  { %p983_p10 = pnand %p981_p9, %p978_p8 }
  0x19   :  { %986 = shalt.err (!%p983_p10)
}
  0x1a   :  { %s987_s20 = scalar_lea.vmem %s1098_s24, 512  ;;  %p992_p12 = scmp.lt.s32.totalorder %s1098_s24, %s1098_s24 }
  0x1b   :  { %p988_p11 = scmp.ne.s32.totalorder %s1098_s24, %s987_s20  ;;  %p993_p13 = scmp.lt.s32.totalorder %s987_s20, %s987_s20 }
  0x1d   :  { %p994_p0 = por %p993_p13, %p992_p12 }
  0x1f   :  { %p995_p1 = pnand %p994_p0, %p988_p11 }
  0x21   :  { %998 = shalt.err (!%p995_p1)
}
  0x22   :  { %29 = dma.hbm_to_vmem [thread:$0]  %s1397_s0, 512, %s1098_s24, [#allocation3], %s1051_s9, %s1051_s9, %s1052_s10  }
  0x23   :  { %s1053_s22 = smov [#allocation6]   ;;  %s1054_s25 = smov [#allocation7]  }
  0x24   :  { %s51_s23 = sshll.u32 %s1053_s22, 4  ;;  %s63_s26 = sshll.u32 %s1054_s25, 4  ;;  %s52_s23 = int_to_ptr.vmem [resolvable:$true] %s51_s23  ;;  %s1135_s26 = int_to_ptr.vmem [resolvable:$true] %s63_s26 }
  0x25   :  { %s999_s29 = scalar_lea.hbm %s1399_s2, 2048 }
  0x26   :  { %p1000_p2 = scmp.ne.s32.totalorder %s1399_s2, %s999_s29  ;;  %p1003_p3 = scmp.lt.u32.totalorder %s999_s29, %s1399_s2 }
  0x28   :  { %p1005_p4 = pnand %p1003_p3, %p1000_p2 }
  0x2a   :  { %1008 = shalt.err (!%p1005_p4)
}
  0x2b   :  { %s1009_s0 = scalar_lea.vmem %s52_s23, 2048  ;;  %p1014_p6 = scmp.lt.s32.totalorder %s52_s23, %s52_s23 }
  0x2c   :  { %p1010_p5 = scmp.ne.s32.totalorder %s52_s23, %s1009_s0  ;;  %p1015_p7 = scmp.lt.s32.totalorder %s1009_s0, %s1009_s0 }
  0x2e   :  { %p1016_p8 = por %p1015_p7, %p1014_p6 }
  0x30   :  { %p1017_p9 = pnand %p1016_p8, %p1010_p5 }
  0x32   :  { %1020 = shalt.err (!%p1017_p9)
}
  0x33   :  { %57 = dma.hbm_to_vmem [thread:$0]  %s1399_s2, 2048, %s52_s23, [#allocation5], %s1051_s9, %s1051_s9, %s1052_s10  }
  0x34   :  { %s1021_s15 = scalar_lea.hbm %s1400_s3, 2048 }
  0x35   :  { %p1022_p10 = scmp.ne.s32.totalorder %s1400_s3, %s1021_s15  ;;  %p1025_p11 = scmp.lt.u32.totalorder %s1021_s15, %s1400_s3 }
  0x37   :  { %p1027_p12 = pnand %p1025_p11, %p1022_p10 }
  0x39   :  { %1030 = shalt.err (!%p1027_p12)
}
  0x3a   :  { %s1031_s20 = scalar_lea.vmem %s1135_s26, 2048  ;;  %p1036_p0 = scmp.lt.s32.totalorder %s1135_s26, %s1135_s26 }
  0x3b   :  { %p1032_p13 = scmp.ne.s32.totalorder %s1135_s26, %s1031_s20  ;;  %p1037_p1 = scmp.lt.s32.totalorder %s1031_s20, %s1031_s20 }
  0x3d   :  { %p1038_p2 = por %p1037_p1, %p1036_p0 }
  0x3f   :  { %p1039_p3 = pnand %p1038_p2, %p1032_p13 }
  0x41   :  { %1042 = shalt.err (!%p1039_p3)
}
  0x42   :  { %69 = dma.hbm_to_vmem [thread:$0]  %s1400_s3, 2048, %s1135_s26, [#allocation8], %s1051_s9, %s1051_s9, %s1052_s10  }
  0x43   :  { %1043 = dma.done.wait [#allocation3], 512  }
  0x44   :  { %1044 = vsyncadd [#allocation3], 4294966784 }
  0x45   :  { %1045 = dma.done.wait [#allocation5], 2560  }
  0x46   :  { %1046 = vsyncadd [#allocation5], 4294964736 }
  0x47   :  { %1047 = dma.done.wait [#allocation8], 2048  }
  0x48   :  { %1048 = vsyncadd [#allocation8], 4294965248  ;;  %v1055_v0 = vmov 0   ;;  %v100_v1 = vld [vmem:[#allocation2 + $0x8] sm:$0xff]  ;;  %v101_v3 = vld [vmem:[#allocation2 + $0x10] sm:$0xff]  ;;  %vm115_vm0 = vcmask 130048  }
  0x49   :  { %953 = vset.pattern.permute.xlu1 %v1055_v0  ;;  %954 = vset.pattern.permute.xlu0 %v1055_v0  ;;  %v104_v2 = vld [vmem:[#allocation4 + $0x8] sm:$0xff]  ;;  %v105_v5 = vld [vmem:[#allocation4 + $0x10] sm:$0xff]  ;;  %v102_v6 = vld [vmem:[#allocation2 + $0x18] sm:$0xff]  ;;  %s1056_s3 = smov 1   ;;  %s1057_s9 = smov 2   ;;  %vm240_vm1 = vcmask 1040384  }
  0x4a   :  { %v1172_v4 = vsub.f32 %v100_v1, %v104_v2  ;;  %v106_v7 = vld [vmem:[#allocation4 + $0x18] sm:$0xff]  ;;  %v1174_v8 = vsub.f32 %v101_v3, %v105_v5  ;;  %v99_v10 = vld [vmem:[#allocation2] sm:$0xff]  ;;  %v137_v25 = vld [vmem:[#allocation6 + $0x8] sm:$0xff]  ;;  %s1058_s26 = smov 4   ;;  %s1059_s27 = smov 127   ;;  %vm305_vm2 = vcmask 1046528  }
  0x4b   :  { %v1176_v9 = vsub.f32 %v102_v6, %v106_v7  ;;  %v103_v11 = vld [vmem:[#allocation4] sm:$0xff]  ;;  %v138_v26 = vld [vmem:[#allocation6 + $0x10] sm:$0xff]  ;;  %v139_v27 = vld [vmem:[#allocation6 + $0x18] sm:$0xff]  ;;  %s1060_s28 = smov 126   ;;  %vm322_vm3 = vcmask 129024   ;;  %vm217_vm4 = vcmask 121856  }
  0x4c   :  { %147 = vrot.lane.b32.xlu1 %v1172_v4, %s1056_s3  ;;  %v1180_v12 = vsub.f32 %v99_v10, %v103_v11  ;;  %v112_v13 = vmul.f32 %v1172_v4, %v1172_v4  ;;  %v113_v14 = vmul.f32 %v1174_v8, %v1174_v8  ;;  %v136_v24 = vld [vmem:[#allocation6] sm:$0xff]  ;;  %v341_v31 = vld [vmem:[#allocation6 + $0x28] sm:$0xff]  ;;  %v342_v33 = vld [vmem:[#allocation6 + $0x30] sm:$0xff]  ;;  %vm418_vm5 = vcmask 113664  }
  0x4d   :  { %v114_v16 = vmul.f32 %v1176_v9, %v1176_v9  ;;  %v906_v28 = vld [vmem:[%s1402_s5] ss:$0 sm:$0xff]  ;;  %v236_v32 = vld [vmem:[#allocation7 + $0x8] sm:$0xff]  ;;  %v237_v34 = vld [vmem:[#allocation7 + $0x10] sm:$0xff]  ;;  %vm443_vm6 = vcmask 1041408   ;;  %vm646_vm7 = vcmask 1043456  }
  0x4e   :  { %v111_v15 = vmul.f32 %v1180_v12, %v1180_v12  ;;  %v117_v17 = vsel %vm115_vm0, %v112_v13, 0.0  ;;  %v119_v19 = vsel %vm115_vm0, %v113_v14, 0.0  ;;  %v340_v29 = vld [vmem:[#allocation6 + $0x20] sm:$0xff]  ;;  %v343_v35 = vld [vmem:[#allocation6 + $0x38] sm:$0xff]  ;;  %v544_v39 = vld [vmem:[#allocation6 + $0x48] sm:$0xff]  ;;  %vm508_vm8 = vcmask 1045504  }
  0x4f   :  { %v121_v21 = vsel %vm115_vm0, %v114_v16, 0.0  ;;  %v235_v30 = vld [vmem:[#allocation7] sm:$0xff]  ;;  %v238_v36 = vld [vmem:[#allocation7 + $0x18] sm:$0xff]  ;;  %v746_v41 = vld [vmem:[#allocation6 + $0x68] sm:$0xff]  ;;  %vm525_vm9 = vcmask 128000   ;;  %vm727_vm10 = vcmask 125952  }
  0x50   :  { %149 = vrot.lane.b32.xlu1 %v1174_v8, %s1056_s3  ;;  %v116_v18 = vsel %vm115_vm0, %v111_v15, 0.0  ;;  %v909_v37 = vld [vmem:[%s1402_s5 + $0x1] ss:$0 sm:$0xff]  ;;  %v545_v42 = vld [vmem:[#allocation6 + $0x50] sm:$0xff]  ;;  %vm621_vm11 = vcmask 97280   ;;  %vm823_vm12 = vcmask 64512  }
  0x51   :  { %v118_v20 = vadd.f32 %v117_v17, %v116_v18  ;;  %v543_v38 = vld [vmem:[#allocation6 + $0x40] sm:$0xff]  ;;  %v747_v43 = vld [vmem:[#allocation6 + $0x70] sm:$0xff] }
  0x52   :  { %v745_v40 = vld [vmem:[#allocation6 + $0x60] sm:$0xff] }
  0x53   :  { %v120_v22 = vadd.f32 %v119_v19, %v118_v20 }
  0x54   :  { %151 = vrot.lane.b32.xlu1 %v1176_v9, %s1056_s3 }
  0x55   :  { %v122_v23 = vadd.f32 %v121_v21, %v120_v22 }
  0x57   :  { %123 = vadd.xlane.f32.xlu0 %v122_v23 }
  0x58   :  { %167 = vperm.xlu1 %953, %v136_v24  }
  0x5c   :  { %172 = vperm.xlu1 %953, %v137_v25  }
  0x60   :  { %177 = vperm.xlu1 %953, %v138_v26  }
  0x64   :  { %182 = vperm.xlu1 %953, %v139_v27  }
  0x68   :  { %346 = vrot.lane.b32.xlu1 %v1180_v12, %s1057_s9 }
  0x6c   :  { %350 = vrot.lane.b32.xlu1 %v1174_v8, %s1057_s9 }
  0x6d   :  { %145 = vrot.lane.b32.xlu0 %v1180_v12, %s1056_s3 }
  0x70   :  { %352 = vrot.lane.b32.xlu1 %v1176_v9, %s1057_s9 }
  0x71   :  { %194 = vrot.lane.b32.xlu0 %v906_v28, %s1056_s3 }
  0x74   :  { %368 = vperm.xlu1 %953, %v340_v29  }
  0x75   :  { %262 = vperm.xlu0 %954, %v235_v30  }
  0x78   :  { %373 = vperm.xlu1 %953, %v341_v31  }
  0x79   :  { %266 = vperm.xlu0 %954, %v236_v32  }
  0x7c   :  { %378 = vperm.xlu1 %953, %v342_v33   ;;  %v244_v33 = vrot.slane %v1174_v8, 7 }
  0x7d   :  { %270 = vperm.xlu0 %954, %v237_v34  }
  0x80   :  { %383 = vperm.xlu1 %953, %v343_v35   ;;  %v242_v35 = vrot.slane %v1172_v4, 7 }
  0x81   :  { %274 = vperm.xlu0 %954, %v238_v36  }
  0x85   :  { %348 = vrot.lane.b32.xlu0 %v1172_v4, %s1057_s9 }
  0x89   :  { %395 = vrot.lane.b32.xlu0 %v909_v37, %s1057_s9 }
  0x8d   :  { %571 = vperm.xlu0 %954, %v543_v38   ;;  %v246_v38 = vrot.slane %v1176_v9, 7 }
  0x91   :  { %576 = vperm.xlu0 %954, %v544_v39  }
  0x95   :  { %773 = vperm.xlu0 %954, %v745_v40  }
  0x99   :  { %778 = vperm.xlu0 %954, %v746_v41   ;;  %v241_v41 = vrot.slane %v1180_v12, 7 }
  0x9d   :  { %581 = vperm.xlu0 %954, %v545_v42  }
  0xa1   :  { %783 = vperm.xlu0 %954, %v747_v43  }
  0xa5   :  { %549 = vrot.lane.b32.xlu0 %v1180_v12, %s1058_s26 }
  0xa9   :  { %551 = vrot.lane.b32.xlu0 %v1172_v4, %s1058_s26 }
  0xbe   :  { %v148_v44 = vpop.permute.xlu1 %147 }
  0xbf   :  { %v158_v52 = vsub.f32 %v1172_v4, %v148_v44  ;;  %v245_v44 = vsel %vm240_vm1, %v242_v35, %v244_v33 }
  0xc1   :  { %v162_v57 = vand.u32 2147483647, %v158_v52 }
  0xc2   :  { %v150_v45 = vpop.permute.xlu1 %149 }
  0xc3   :  { %v159_v61 = vsub.f32 %v1174_v8, %v150_v45 }
  0xc5   :  { %v163_v10 = vand.u32 2147483647, %v159_v61 }
  0xc6   :  { %v152_v46 = vpop.permute.xlu1 %151 }
  0xc7   :  { %v160_v58 = vsub.f32 %v1176_v9, %v152_v46 }
  0xc9   :  { %v164_v3 = vand.u32 2147483647, %v160_v58  ;;  %v252_v58 = vsub.f32 %v1180_v12, %v241_v41 }
  0xd7   :  { %v168_v47 = vpop.permute.xlu1 %167 }
  0xdb   :  { %v173_v48 = vpop.permute.xlu1 %172 }
  0xdc   :  { %v186_v62 = vmul.f32 %v173_v48, %v162_v57  ;;  %v247_v48 = vsel %vm240_vm1, %v244_v33, %v246_v38 }
  0xdf   :  { %v178_v49 = vpop.permute.xlu1 %177 }
  0xe0   :  { %v187_v15 = vmul.f32 %v178_v49, %v163_v10  ;;  %v907_v10 = vld [vmem:[%s1401_s4] ss:$0 sm:$0xff] }
  0xe3   :  { %v183_v50 = vpop.permute.xlu1 %182 }
  0xe4   :  { %v124_v51 = vpop.xlane.xlu0 %123  ;;  %v188_v11 = vmul.f32 %v183_v50, %v164_v3 }
  0xe5   :  { %v125_v53 = vrot.slane %v124_v51, 4 }
  0xe7   :  { %v126_v54 = vadd.f32 %v125_v53, %v124_v51  ;;  %v347_v55 = vpop.permute.xlu1 %346  ;;  %v254_v51 = vsub.f32 %v1174_v8, %v245_v44  ;;  %v748_v44 = vld [vmem:[#allocation6 + $0x78] sm:$0xff] }
  0xe8   :  { %v146_v56 = vpop.permute.xlu0 %145  ;;  %v358_v25 = vsub.f32 %v1180_v12, %v347_v55  ;;  %v255_v55 = vsub.f32 %v1176_v9, %v247_v48 }
  0xe9   :  { %v127_v59 = vrot.slane %v126_v54, 2  ;;  %v157_v60 = vsub.f32 %v1180_v12, %v146_v56 }
  0xea   :  { %v362_v28 = vand.u32 2147483647, %v358_v25  ;;  %v641_v25 = vld [vmem:[#allocation7 + $0x48] sm:$0xff] }
  0xeb   :  { %v161_v63 = vand.u32 2147483647, %v157_v60  ;;  %v128_v0 = vadd.f32 %v127_v59, %v126_v54  ;;  %v351_v2 = vpop.permute.xlu1 %350  ;;  %v258_v59 = vand.u32 2147483647, %v254_v51 }
  0xec   :  { %v195_v1 = vpop.permute.xlu0 %194  ;;  %v360_v29 = vsub.f32 %v1174_v8, %v351_v2  ;;  %v256_v2 = vand.u32 2147483647, %v252_v58  ;;  %v642_v58 = vld [vmem:[#allocation7 + $0x50] sm:$0xff] }
  0xed   :  { %v185_v5 = vmul.f32 %v168_v47, %v161_v63  ;;  %v198_v6 = vmul.f32 %v195_v1, %v186_v62  ;;  %v129_v7 = vrot.slane %v128_v0, 1  ;;  %v200_v16 = vmul.f32 %v195_v1, %v188_v11 }
  0xee   :  { %v199_v18 = vmul.f32 %v195_v1, %v187_v15  ;;  %v364_v37 = vand.u32 2147483647, %v360_v29  ;;  %v243_v47 = vsel %vm240_vm1, %v241_v41, %v242_v35  ;;  %v259_v63 = vand.u32 2147483647, %v255_v55  ;;  %v437_v15 = vld [vmem:[#allocation7 + $0x20] sm:$0xff] }
  0xef   :  { %207 = vrot.lane.b32.xlu0 %v198_v6, %s1059_s27  ;;  %v130_v13 = vadd.f32 %v129_v7, %v128_v0  ;;  %v197_v14 = vmul.f32 %v195_v1, %v185_v5  ;;  %v353_v17 = vpop.permute.xlu1 %352  ;;  %v253_v54 = vsub.f32 %v1172_v4, %v243_v47  ;;  %v913_v7 = vld [vmem:[%s1402_s5 + $0x2] ss:$0 sm:$0xff]  ;;  %v917_v47 = vld [vmem:[%s1402_s5 + $0x3] ss:$0 sm:$0xff]  ;;  %s1061_s5 = smov 124  }
  0xf0   :  { %v361_v31 = vsub.f32 %v1176_v9, %v353_v17 }
  0xf1   :  { %920 = vpush %v130_v13  ;;  %205 = vrot.lane.b32.xlu1 %v197_v14, %s1059_s27  ;;  %v257_v62 = vand.u32 2147483647, %v253_v54 }
  0xf2   :  { %v365_v43 = vand.u32 2147483647, %v361_v31  ;;  %v440_v31 = vld [vmem:[#allocation7 + $0x38] sm:$0xff] }
  0xf3   :  { %211 = vrot.lane.b32.xlu0 %v200_v16, %s1059_s27  ;;  %v369_v20 = vpop.permute.xlu1 %368 }
  0xf4   :  { %v1219_v19 = vpop.permute.xlu0 %262  ;;  %v386_v32 = vmul.f32 %v369_v20, %v362_v28  ;;  %v439_v20 = vld [vmem:[#allocation7 + $0x30] sm:$0xff] }
  0xf5   :  { %209 = vrot.lane.b32.xlu1 %v199_v18, %s1059_s27  ;;  %v276_v60 = vrot.slane %v1219_v19, 7 }
  0xf7   :  { %v374_v23 = vpop.permute.xlu1 %373  ;;  %v287_v11 = vmul.f32 %v276_v60, %v256_v2 }
  0xf8   :  { %v267_v21 = vpop.permute.xlu0 %266 }
  0xf9   :  { %v277_v56 = vrot.slane %v267_v21, 7  ;;  %v297_v17 = vmul.f32 %v907_v10, %v287_v11 }
  0xfb   :  { %v379_v26 = vpop.permute.xlu1 %378  ;;  %v278_v0 = vsel %vm240_vm1, %v276_v60, %v277_v56 }
  0xfc   :  { %v271_v22 = vpop.permute.xlu0 %270  ;;  %v388_v45 = vmul.f32 %v379_v26, %v364_v37  ;;  %v288_v5 = vmul.f32 %v278_v0, %v257_v62  ;;  %v844_v37 = vld [vmem:[#allocation7 + $0x70] sm:$0xff]  ;;  %v643_v62 = vld [vmem:[#allocation7 + $0x58] sm:$0xff]  ;;  %v843_v0 = vld [vmem:[#allocation7 + $0x68] sm:$0xff] }
  0xfd   :  { %v279_v52 = vrot.slane %v271_v22, 7  ;;  %v306_v22 = vrot.slane %v297_v17, 1 }
  0xfe   :  { %v298_v14 = vmul.f32 %v907_v10, %v288_v5 }
  0xff   :  { %v384_v42 = vpop.permute.xlu1 %383  ;;  %v280_v61 = vsel %vm240_vm1, %v277_v56, %v279_v52 }
 0x100   :  { %v275_v24 = vpop.permute.xlu0 %274  ;;  %v389_v49 = vmul.f32 %v384_v42, %v365_v43  ;;  %v289_v3 = vmul.f32 %v280_v61, %v258_v59  ;;  %v307_v19 = vrot.slane %v298_v14, 1  ;;  %v546_v42 = vld [vmem:[#allocation6 + $0x58] sm:$0xff] }
 0x101   :  { %v281_v57 = vrot.slane %v275_v24, 7 }
 0x102   :  { %v299_v13 = vmul.f32 %v907_v10, %v289_v3  ;;  %v308_v26 = vsel %vm305_vm2, %v306_v22, %v307_v19 }
 0x103   :  { %v282_v1 = vsel %vm240_vm1, %v279_v52, %v281_v57  ;;  %v317_v29 = vsel %vm115_vm0, %v308_v26, 0.0  ;;  %v640_v52 = vld [vmem:[#allocation7 + $0x40] sm:$0xff] }
 0x104   :  { %v349_v27 = vpop.permute.xlu0 %348  ;;  %v290_v6 = vmul.f32 %v282_v1, %v259_v63  ;;  %v309_v18 = vrot.slane %v299_v13, 1 }
 0x105   :  { %v359_v30 = vsub.f32 %v1172_v4, %v349_v27 }
 0x106   :  { %v300_v16 = vmul.f32 %v907_v10, %v290_v6 }
 0x107   :  { %v363_v34 = vand.u32 2147483647, %v359_v30 }
 0x108   :  { %v396_v36 = vpop.permute.xlu0 %395  ;;  %v311_v21 = vrot.slane %v300_v16, 1 }
 0x109   :  { %v387_v39 = vmul.f32 %v374_v23, %v363_v34  ;;  %v398_v40 = vmul.f32 %v396_v36, %v386_v32  ;;  %v400_v50 = vmul.f32 %v396_v36, %v388_v45  ;;  %v401_v53 = vmul.f32 %v396_v36, %v389_v49  ;;  %v842_v34 = vld [vmem:[#allocation7 + $0x60] sm:$0xff]  ;;  %v438_v49 = vld [vmem:[#allocation7 + $0x28] sm:$0xff] }
 0x10a   :  { %v310_v23 = vsel %vm305_vm2, %v307_v19, %v309_v18  ;;  %v312_v27 = vsel %vm305_vm2, %v309_v18, %v311_v21  ;;  %v323_v35 = vsel %vm322_vm3, %v311_v21, 0.0 }
 0x10b   :  { %406 = vrot.lane.b32.xlu1 %v398_v40, %s1060_s28  ;;  %v399_v46 = vmul.f32 %v396_v36, %v387_v39  ;;  %v318_v28 = vsel %vm115_vm0, %v310_v23, 0.0  ;;  %v320_v30 = vsel %vm115_vm0, %v312_v27, 0.0 }
 0x10c   :  { %v319_v32 = vadd.f32 %v318_v28, %v317_v29  ;;  %v572_v38 = vpop.permute.xlu0 %571 }
 0x10d   :  { %408 = vrot.lane.b32.xlu0 %v399_v46, %s1060_s28 }
 0x10e   :  { %v321_v33 = vadd.f32 %v320_v30, %v319_v32 }
 0x10f   :  { %410 = vrot.lane.b32.xlu1 %v400_v50, %s1060_s28 }
 0x110   :  { %v324_v36 = vadd.f32 %v323_v35, %v321_v33  ;;  %v577_v39 = vpop.permute.xlu0 %576 }
 0x111   :  { %412 = vrot.lane.b32.xlu0 %v401_v53, %s1060_s28 }
 0x113   :  { %753 = vrot.lane.b32.xlu1 %v1172_v4, %s1052_s10 }
 0x114   :  { %v1257_v40 = vpop.permute.xlu0 %773 }
 0x117   :  { %555 = vrot.lane.b32.xlu1 %v1176_v9, %s1058_s26 }
 0x118   :  { %v1259_v41 = vpop.permute.xlu0 %778 }
 0x11b   :  { %598 = vrot.lane.b32.xlu1 %v913_v7, %s1058_s26 }
 0x11c   :  { %v1263_v43 = vpop.permute.xlu0 %581 }
 0x11f   :  { %465 = vperm.xlu1 %953, %v437_v15  }
 0x120   :  { %v1265_v45 = vpop.permute.xlu0 %783 }
 0x122   :  { %s921_s11 = spop %920 }
 0x123   :  { %v133_v24 = vstv %s921_s11  ;;  %473 = vperm.xlu1 %953, %v439_v20  }
 0x124   :  { %135 = vst [vmem:[%s1403_s6] sm:$0xff] %v133_v24  ;;  %v550_v46 = vpop.permute.xlu0 %549 }
 0x125   :  { %v561_v14 = vsub.f32 %v1180_v12, %v550_v46 }
 0x127   :  { %672 = vperm.xlu1 %953, %v641_v25   ;;  %v565_v19 = vand.u32 2147483647, %v561_v14  ;;  %v652_v14 = vrot.slane %v1176_v9, 4 }
 0x128   :  { %v552_v48 = vpop.permute.xlu0 %551 }
 0x129   :  { %v562_v15 = vsub.f32 %v1172_v4, %v552_v48  ;;  %v589_v22 = vmul.f32 %v572_v38, %v565_v19 }
 0x12b   :  { %477 = vperm.xlu1 %953, %v440_v31   ;;  %v566_v20 = vand.u32 2147483647, %v562_v15 }
 0x12d   :  { %v590_v23 = vmul.f32 %v577_v39, %v566_v20 }
 0x12f   :  { %855 = vperm.xlu1 %953, %v842_v34  }
 0x130   :  { %325 = vadd.xlane.f32.xlu0 %v324_v36 }
 0x133   :  { %865 = vperm.xlu1 %953, %v844_v37  }
 0x146   :  { %751 = vrot.lane.b32.xlu0 %v1180_v12, %s1052_s10 }
 0x14a   :  { %586 = vperm.xlu0 %954, %v546_v42  }
 0x14e   :  { %788 = vperm.xlu0 %954, %v748_v44  }
 0x152   :  { %553 = vrot.lane.b32.xlu0 %v1174_v8, %s1058_s26 }
 0x156   :  { %755 = vrot.lane.b32.xlu0 %v1174_v8, %s1052_s10 }
 0x15a   :  { %757 = vrot.lane.b32.xlu0 %v1176_v9, %s1052_s10 }
 0x15e   :  { %800 = vrot.lane.b32.xlu0 %v917_v47, %s1052_s10  ;;  %s1062_s10 = smov 120  }
 0x161   :  { %v208_v50 = vpop.permute.xlu0 %207 }
 0x162   :  { %469 = vperm.xlu0 %954, %v438_v49   ;;  %v219_v53 = vsel %vm217_vm4, %v208_v50, 0.0 }
 0x163   :  { %v206_v51 = vpop.permute.xlu1 %205 }
 0x164   :  { %v218_v54 = vsel %vm217_vm4, %v206_v51, 0.0 }
 0x165   :  { %v220_v55 = vadd.f32 %v219_v53, %v218_v54  ;;  %v212_v56 = vpop.permute.xlu0 %211  ;;  %v444_v54 = vrot.slane %v1180_v12, 6 }
 0x166   :  { %668 = vperm.xlu0 %954, %v640_v52   ;;  %v223_v61 = vsel %vm217_vm4, %v212_v56, 0.0  ;;  %v445_v52 = vrot.slane %v1172_v4, 6 }
 0x167   :  { %v210_v57 = vpop.permute.xlu1 %209  ;;  %v455_v15 = vsub.f32 %v1180_v12, %v444_v54 }
 0x168   :  { %v221_v59 = vsel %vm217_vm4, %v210_v57, 0.0 }
 0x169   :  { %v222_v60 = vadd.f32 %v221_v59, %v220_v55  ;;  %v447_v55 = vrot.slane %v1174_v8, 6 }
 0x16a   :  { %676 = vperm.xlu0 %954, %v642_v58  }
 0x16b   :  { %v1277_v63 = vadd.f32 %v223_v61, %v222_v60  ;;  %v448_v61 = vsel %vm443_vm6, %v445_v52, %v447_v55 }
 0x16e   :  { %680 = vperm.xlu0 %954, %v643_v62   ;;  %v449_v62 = vrot.slane %v1176_v9, 6 }
 0x172   :  { %860 = vperm.xlu0 %954, %v843_v0  }
 0x17d   :  { %v407_v1 = vpop.permute.xlu1 %406 }
 0x17e   :  { %v419_v3 = vsel %vm418_vm5, %v407_v1, 0.0 }
 0x17f   :  { %v409_v2 = vpop.permute.xlu0 %408 }
 0x180   :  { %v420_v5 = vsel %vm418_vm5, %v409_v2, 0.0 }
 0x181   :  { %v421_v6 = vadd.f32 %v420_v5, %v419_v3  ;;  %v411_v7 = vpop.permute.xlu1 %410 }
 0x182   :  { %v422_v10 = vsel %vm418_vm5, %v411_v7, 0.0  ;;  %v457_v7 = vsub.f32 %v1174_v8, %v448_v61 }
 0x183   :  { %v423_v11 = vadd.f32 %v422_v10, %v421_v6  ;;  %v413_v13 = vpop.permute.xlu0 %412  ;;  %v647_v10 = vrot.slane %v1180_v12, 4 }
 0x184   :  { %v424_v16 = vsel %vm418_vm5, %v413_v13, 0.0 }
 0x185   :  { %v754_v17 = vpop.permute.xlu1 %753  ;;  %v1281_v18 = vadd.f32 %v424_v16, %v423_v11  ;;  %v648_v11 = vrot.slane %v1172_v4, 4  ;;  %v450_v16 = vsel %vm443_vm6, %v447_v55, %v449_v62 }
 0x186   :  { %v764_v32 = vsub.f32 %v1172_v4, %v754_v17 }
 0x188   :  { %v768_v37 = vand.u32 2147483647, %v764_v32 }
 0x189   :  { %v556_v21 = vpop.permute.xlu1 %555 }
 0x18a   :  { %v564_v42 = vsub.f32 %v1176_v9, %v556_v21  ;;  %v792_v48 = vmul.f32 %v1259_v41, %v768_v37 }
 0x18c   :  { %v568_v53 = vand.u32 2147483647, %v564_v42 }
 0x18d   :  { %v1283_v24 = vpop.permute.xlu1 %598 }
 0x18e   :  { %v601_v25 = vmul.f32 %v1283_v24, %v589_v22  ;;  %v602_v26 = vmul.f32 %v1283_v24, %v590_v23 }
 0x190   :  { %609 = vrot.lane.b32.xlu0 %v601_v25, %s1061_s5  ;;  %611 = vrot.lane.b32.xlu1 %v602_v26, %s1061_s5  ;;  %v461_v26 = vand.u32 2147483647, %v457_v7 }
 0x19e   :  { %v1293_v35 = vpop.permute.xlu1 %465 }
 0x19f   :  { %v479_v20 = vrot.slane %v1293_v35, 6 }
 0x1a2   :  { %v1300_v49 = vpop.permute.xlu1 %473 }
 0x1a3   :  { %v482_v21 = vrot.slane %v1300_v49, 6  ;;  %v911_v49 = vld [vmem:[%s1401_s4 + $0x1] ss:$0 sm:$0xff] }
 0x1a6   :  { %v673_v1 = vpop.permute.xlu1 %672 }
 0x1bd   :  { %v1289_v27 = vpop.xlane.xlu0 %325 }
 0x1c1   :  { %v752_v28 = vpop.permute.xlu0 %751 }
 0x1c2   :  { %v763_v33 = vsub.f32 %v1180_v12, %v752_v28  ;;  %v649_v28 = vsel %vm646_vm7, %v647_v10, %v648_v11 }
 0x1c3   :  { %v659_v37 = vsub.f32 %v1172_v4, %v649_v28 }
 0x1c4   :  { %v767_v38 = vand.u32 2147483647, %v763_v33  ;;  %v459_v33 = vand.u32 2147483647, %v455_v15 }
 0x1c5   :  { %v663_v55 = vand.u32 2147483647, %v659_v37 }
 0x1c6   :  { %v791_v50 = vmul.f32 %v1257_v40, %v767_v38  ;;  %v446_v40 = vsel %vm443_vm6, %v444_v54, %v445_v52 }
 0x1c7   :  { %v456_v6 = vsub.f32 %v1172_v4, %v446_v40 }
 0x1c9   :  { %v587_v29 = vpop.permute.xlu0 %586  ;;  %v460_v25 = vand.u32 2147483647, %v456_v6 }
 0x1ca   :  { %v592_v2 = vmul.f32 %v587_v29, %v568_v53  ;;  %v478_v29 = vpop.permute.xlu1 %477 }
 0x1cc   :  { %v604_v22 = vmul.f32 %v1283_v24, %v592_v2 }
 0x1cd   :  { %v789_v30 = vpop.permute.xlu0 %788 }
 0x1d1   :  { %v554_v31 = vpop.permute.xlu0 %553 }
 0x1d2   :  { %v563_v36 = vsub.f32 %v1174_v8, %v554_v31 }
 0x1d4   :  { %v567_v46 = vand.u32 2147483647, %v563_v36  ;;  %v658_v36 = vsub.f32 %v1180_v12, %v647_v10 }
 0x1d5   :  { %v756_v34 = vpop.permute.xlu0 %755 }
 0x1d6   :  { %v765_v39 = vsub.f32 %v1174_v8, %v756_v34  ;;  %v591_v57 = vmul.f32 %v1263_v43, %v567_v46  ;;  %v650_v43 = vrot.slane %v1174_v8, 4  ;;  %v458_v34 = vsub.f32 %v1176_v9, %v450_v16 }
 0x1d7   :  { %v662_v54 = vand.u32 2147483647, %v658_v36 }
 0x1d8   :  { %v769_v51 = vand.u32 2147483647, %v765_v39  ;;  %v651_v19 = vsel %vm646_vm7, %v648_v11, %v650_v43  ;;  %v653_v32 = vsel %vm646_vm7, %v650_v43, %v652_v14  ;;  %v484_v39 = vrot.slane %v478_v29, 6 }
 0x1d9   :  { %v758_v44 = vpop.permute.xlu0 %757  ;;  %v661_v46 = vsub.f32 %v1176_v9, %v653_v32 }
 0x1da   :  { %v766_v47 = vsub.f32 %v1176_v9, %v758_v44  ;;  %v793_v41 = vmul.f32 %v1265_v45, %v769_v51  ;;  %v603_v45 = vmul.f32 %v1283_v24, %v591_v57  ;;  %v660_v24 = vsub.f32 %v1174_v8, %v651_v19 }
 0x1db   :  { %v462_v51 = vand.u32 2147483647, %v458_v34 }
 0x1dc   :  { %v770_v58 = vand.u32 2147483647, %v766_v47  ;;  %v683_v47 = vrot.slane %v673_v1, 4  ;;  %v664_v52 = vand.u32 2147483647, %v660_v24 }
 0x1dd   :  { %v801_v56 = vpop.permute.xlu0 %800 }
 0x1de   :  { %v804_v59 = vmul.f32 %v801_v56, %v792_v48  ;;  %v803_v60 = vmul.f32 %v801_v56, %v791_v50  ;;  %v794_v3 = vmul.f32 %v789_v30, %v770_v58  ;;  %v805_v5 = vmul.f32 %v801_v56, %v793_v41 }
 0x1df   :  { %v490_v50 = vmul.f32 %v479_v20, %v459_v33  ;;  %v485_v58 = vsel %vm443_vm6, %v482_v21, %v484_v39  ;;  %v665_v41 = vand.u32 2147483647, %v661_v46 }
 0x1e0   :  { %813 = vrot.lane.b32.xlu1 %v804_v59, %s1062_s10  ;;  %811 = vrot.lane.b32.xlu0 %v803_v60, %s1062_s10  ;;  %v806_v23 = vmul.f32 %v801_v56, %v794_v3  ;;  %v493_v43 = vmul.f32 %v485_v58, %v462_v51  ;;  %v847_v51 = vsub.f32 %v1172_v4, %v1180_v12  ;;  %v919_v58 = vld [vmem:[%s1401_s4 + $0x3] ss:$0 sm:$0xff] }
 0x1e1   :  { %v470_v0 = vpop.permute.xlu0 %469  ;;  %v500_v62 = vmul.f32 %v911_v49, %v490_v50 }
 0x1e2   :  { %v480_v13 = vrot.slane %v470_v0, 6 }
 0x1e3   :  { %v509_v7 = vrot.slane %v500_v62, 2 }
 0x1e4   :  { %815 = vrot.lane.b32.xlu1 %v805_v5, %s1062_s10  ;;  %613 = vrot.lane.b32.xlu0 %v603_v45, %s1061_s5  ;;  %v481_v30 = vsel %vm443_vm6, %v479_v20, %v480_v13  ;;  %v483_v31 = vsel %vm443_vm6, %v480_v13, %v482_v21  ;;  %v915_v5 = vld [vmem:[%s1401_s4 + $0x2] ss:$0 sm:$0xff]  ;;  %v503_v13 = vmul.f32 %v911_v49, %v493_v43 }
 0x1e5   :  { %v669_v17 = vpop.permute.xlu0 %668  ;;  %v491_v42 = vmul.f32 %v481_v30, %v460_v25  ;;  %v492_v44 = vmul.f32 %v483_v31, %v461_v26 }
 0x1e6   :  { %v682_v48 = vrot.slane %v669_v17, 4  ;;  %v514_v25 = vrot.slane %v503_v13, 2 }
 0x1e7   :  { %v501_v59 = vmul.f32 %v911_v49, %v491_v42  ;;  %v502_v60 = vmul.f32 %v911_v49, %v492_v44 }
 0x1e8   :  { %817 = vrot.lane.b32.xlu1 %v806_v23, %s1062_s10  ;;  %615 = vrot.lane.b32.xlu0 %v604_v22, %s1061_s5  ;;  %v684_v40 = vsel %vm646_vm7, %v682_v48, %v683_v47  ;;  %v693_v1 = vmul.f32 %v682_v48, %v662_v54  ;;  %v848_v48 = vsub.f32 %v1174_v8, %v1172_v4 }
 0x1e9   :  { %v677_v35 = vpop.permute.xlu0 %676  ;;  %v510_v2 = vrot.slane %v501_v59, 2  ;;  %v512_v3 = vrot.slane %v502_v60, 2  ;;  %v694_v45 = vmul.f32 %v684_v40, %v663_v55  ;;  %v850_v55 = vand.u32 2147483647, %v847_v51 }
 0x1ea   :  { %v685_v38 = vrot.slane %v677_v35, 4  ;;  %v703_v11 = vmul.f32 %v915_v5, %v693_v1 }
 0x1eb   :  { %v704_v14 = vmul.f32 %v915_v5, %v694_v45  ;;  %v511_v15 = vsel %vm508_vm8, %v509_v7, %v510_v2  ;;  %v513_v16 = vsel %vm508_vm8, %v510_v2, %v512_v3  ;;  %v515_v28 = vsel %vm508_vm8, %v512_v3, %v514_v25 }
 0x1ec   :  { %v686_v56 = vsel %vm646_vm7, %v683_v47, %v685_v38  ;;  %v520_v20 = vsel %vm115_vm0, %v511_v15, 0.0  ;;  %v521_v21 = vsel %vm115_vm0, %v513_v16, 0.0  ;;  %v711_v22 = vrot.slane %v703_v11, 4  ;;  %v856_v47 = vpop.permute.xlu1 %855 }
 0x1ed   :  { %v681_v53 = vpop.permute.xlu0 %680  ;;  %v695_v0 = vmul.f32 %v686_v56, %v664_v52  ;;  %v712_v23 = vrot.slane %v704_v14, 4  ;;  %v522_v29 = vadd.f32 %v521_v21, %v520_v20  ;;  %v523_v33 = vsel %vm115_vm0, %v515_v28, 0.0 }
 0x1ee   :  { %v687_v57 = vrot.slane %v681_v53, 4  ;;  %v851_v52 = vand.u32 2147483647, %v848_v48  ;;  %v849_v56 = vsub.f32 %v1176_v9, %v1174_v8  ;;  %v868_v59 = vmul.f32 %v856_v47, %v850_v55 }
 0x1ef   :  { %v705_v10 = vmul.f32 %v915_v5, %v695_v0  ;;  %v713_v31 = vsel %vm646_vm7, %v711_v22, %v712_v23  ;;  %v524_v24 = vadd.f32 %v523_v33, %v522_v29  ;;  %v327_v22 = vrot.slane %v1289_v27, 4 }
 0x1f0   :  { %v688_v61 = vsel %vm646_vm7, %v685_v38, %v687_v57  ;;  %v722_v35 = vsel %vm115_vm0, %v713_v31, 0.0  ;;  %v526_v38 = vsel %vm525_vm9, %v514_v25, 0.0  ;;  %v866_v49 = vpop.permute.xlu1 %865  ;;  %v852_v60 = vand.u32 2147483647, %v849_v56 }
 0x1f1   :  { %v696_v6 = vmul.f32 %v688_v61, %v665_v41  ;;  %v714_v19 = vrot.slane %v705_v10, 4  ;;  %v527_v39 = vadd.f32 %v526_v38, %v524_v24  ;;  %v861_v50 = vpop.permute.xlu0 %860  ;;  %v877_v62 = vmul.f32 %v919_v58, %v868_v59 }
 0x1f2   :  { %v869_v57 = vmul.f32 %v861_v50, %v851_v52  ;;  %v870_v0 = vmul.f32 %v866_v49, %v852_v60  ;;  %v328_v25 = vadd.f32 %v327_v22, %v1289_v27 }
 0x1f3   :  { %v706_v17 = vmul.f32 %v915_v5, %v696_v6  ;;  %v715_v30 = vsel %vm646_vm7, %v712_v23, %v714_v19  ;;  %v880_v15 = vsel %vm115_vm0, %v877_v62, 0.0 }
 0x1f4   :  { %v723_v34 = vsel %vm115_vm0, %v715_v30, 0.0  ;;  %v878_v41 = vmul.f32 %v919_v58, %v869_v57  ;;  %v879_v11 = vmul.f32 %v919_v58, %v870_v0  ;;  %v329_v28 = vrot.slane %v328_v25, 2 }
 0x1f5   :  { %v716_v26 = vrot.slane %v706_v17, 4  ;;  %v724_v37 = vadd.f32 %v723_v34, %v722_v35 }
 0x1f6   :  { %v881_v5 = vsel %vm115_vm0, %v878_v41, 0.0  ;;  %v883_v20 = vsel %vm115_vm0, %v879_v11, 0.0  ;;  %v330_v24 = vadd.f32 %v329_v28, %v328_v25 }
 0x1f7   :  { %v717_v32 = vsel %vm646_vm7, %v714_v19, %v716_v26  ;;  %v728_v44 = vsel %vm727_vm10, %v716_v26, 0.0  ;;  %v882_v19 = vadd.f32 %v881_v5, %v880_v15 }
 0x1f8   :  { %v725_v36 = vsel %vm115_vm0, %v717_v32, 0.0 }
 0x1f9   :  { %v726_v42 = vadd.f32 %v725_v36, %v724_v37  ;;  %v884_v21 = vadd.f32 %v883_v20, %v882_v19 }
 0x1fb   :  { %v729_v46 = vadd.f32 %v728_v44, %v726_v42 }
 0x202   :  { %v612_v53 = vpop.permute.xlu1 %611  ;;  %v610_v54 = vpop.permute.xlu0 %609 }
 0x203   :  { %v623_v4 = vsel %vm621_vm11, %v612_v53, 0.0  ;;  %v622_v12 = vsel %vm621_vm11, %v610_v54, 0.0 }
 0x204   :  { %v624_v2 = vadd.f32 %v623_v4, %v622_v12 }
 0x207   :  { %528 = vadd.xlane.f32.xlu0 %v527_v39  ;;  %v331_v39 = vrot.slane %v330_v24, 1 }
 0x209   :  { %v332_v27 = vadd.f32 %v331_v39, %v330_v24 }
 0x20b   :  { %730 = vadd.xlane.f32.xlu0 %v729_v46 }
 0x20c   :  { %225 = vadd.xlane.f32.xlu1 %v1277_v63 }
 0x210   :  { %426 = vadd.xlane.f32.xlu1 %v1281_v18 }
 0x252   :  { %v814_v63 = vpop.permute.xlu1 %813  ;;  %v812_v18 = vpop.permute.xlu0 %811 }
 0x253   :  { %v825_v40 = vsel %vm823_vm12, %v814_v63, 0.0  ;;  %v824_v8 = vsel %vm823_vm12, %v812_v18, 0.0 }
 0x254   :  { %v826_v3 = vadd.f32 %v825_v40, %v824_v8 }
 0x256   :  { %v816_v9 = vpop.permute.xlu1 %815  ;;  %v614_v61 = vpop.permute.xlu0 %613 }
 0x257   :  { %v827_v43 = vsel %vm823_vm12, %v816_v9, 0.0  ;;  %v625_v1 = vsel %vm621_vm11, %v614_v61, 0.0 }
 0x258   :  { %v828_v45 = vadd.f32 %v827_v43, %v826_v3  ;;  %v626_v6 = vadd.f32 %v625_v1, %v624_v2 }
 0x25a   :  { %v818_v7 = vpop.permute.xlu1 %817  ;;  %v616_v10 = vpop.permute.xlu0 %615 }
 0x25b   :  { %v829_v13 = vsel %vm823_vm12, %v818_v7, 0.0  ;;  %v627_v14 = vsel %vm621_vm11, %v616_v10, 0.0 }
 0x25c   :  { %v830_v16 = vadd.f32 %v829_v13, %v828_v45  ;;  %v628_v17 = vadd.f32 %v627_v14, %v626_v6 }
 0x25e   :  { %831 = vadd.xlane.f32.xlu0 %v830_v16  ;;  %629 = vadd.xlane.f32.xlu1 %v628_v17 }
 0x262   :  { %885 = vadd.xlane.f32.xlu0 %v884_v21 }
 0x294   :  { %v529_v23 = vpop.xlane.xlu0 %528 }
 0x295   :  { %v530_v26 = vrot.slane %v529_v23, 4 }
 0x297   :  { %v531_v29 = vadd.f32 %v530_v26, %v529_v23 }
 0x298   :  { %v731_v55 = vpop.xlane.xlu0 %730 }
 0x299   :  { %v226_v30 = vpop.xlane.xlu1 %225  ;;  %v532_v33 = vrot.slane %v531_v29, 2  ;;  %v732_v56 = vrot.slane %v731_v55, 4 }
 0x29a   :  { %v227_v31 = vrot.slane %v226_v30, 4 }
 0x29b   :  { %v533_v42 = vadd.f32 %v532_v33, %v531_v29  ;;  %v733_v57 = vadd.f32 %v732_v56, %v731_v55 }
 0x29c   :  { %v228_v32 = vadd.f32 %v227_v31, %v226_v30 }
 0x29d   :  { %v427_v34 = vpop.xlane.xlu1 %426  ;;  %v534_v49 = vrot.slane %v533_v42, 1  ;;  %v734_v63 = vrot.slane %v733_v57, 2 }
 0x29e   :  { %v229_v35 = vrot.slane %v228_v32, 2  ;;  %v428_v36 = vrot.slane %v427_v34, 4 }
 0x29f   :  { %v535_v52 = vadd.f32 %v534_v49, %v533_v42  ;;  %v735_v40 = vadd.f32 %v734_v63, %v733_v57 }
 0x2a0   :  { %v429_v37 = vadd.f32 %v428_v36, %v427_v34  ;;  %v230_v38 = vadd.f32 %v229_v35, %v228_v32 }
 0x2a1   :  { %v736_v1 = vrot.slane %v735_v40, 1 }
 0x2a2   :  { %v430_v44 = vrot.slane %v429_v37, 2  ;;  %v231_v46 = vrot.slane %v230_v38, 1 }
 0x2a3   :  { %v737_v10 = vadd.f32 %v736_v1, %v735_v40 }
 0x2a4   :  { %v232_v47 = vadd.f32 %v231_v46, %v230_v38  ;;  %v431_v48 = vadd.f32 %v430_v44, %v429_v37 }
 0x2a6   :  { %922 = vpush %v232_v47  ;;  %v432_v50 = vrot.slane %v431_v48, 1 }
 0x2a7   :  { %924 = vpush %v332_v27 }
 0x2a8   :  { %v433_v51 = vadd.f32 %v432_v50, %v431_v48 }
 0x2aa   :  { %926 = vpush %v433_v51 }
 0x2ab   :  { %928 = vpush %v535_v52 }
 0x2d7   :  { %s923_s4 = spop %922 }
 0x2d8   :  { %s925_s20 = spop %924 }
 0x2d9   :  { %s334_s2 = sadd.f32 %s925_s20, %s923_s4 }
 0x2db   :  { %v336_v53 = vstv %s334_s2  ;;  %s927_s1 = spop %926 }
 0x2dc   :  { %s929_s3 = spop %928  ;;  %338 = vst [vmem:[%s1403_s6 + $0x8] sm:$0xff] %v336_v53 }
 0x2dd   :  { %s537_s9 = sadd.f32 %s929_s3, %s927_s1 }
 0x2df   :  { %v539_v54 = vstv %s537_s9 }
 0x2e0   :  { %541 = vst [vmem:[%s1403_s6 + $0x10] sm:$0xff] %v539_v54 }
 0x2eb   :  { %v630_v18 = vpop.xlane.xlu1 %629  ;;  %v832_v58 = vpop.xlane.xlu0 %831 }
 0x2ec   :  { %v631_v59 = vrot.slane %v630_v18, 4  ;;  %v833_v60 = vrot.slane %v832_v58, 4 }
 0x2ee   :  { %v632_v41 = vadd.f32 %v631_v59, %v630_v18  ;;  %v834_v4 = vadd.f32 %v833_v60, %v832_v58 }
 0x2ef   :  { %v886_v12 = vpop.xlane.xlu0 %885 }
 0x2f0   :  { %v633_v8 = vrot.slane %v632_v41, 2  ;;  %v835_v9 = vrot.slane %v834_v4, 2  ;;  %v887_v61 = vrot.slane %v886_v12, 4 }
 0x2f2   :  { %v634_v62 = vadd.f32 %v633_v8, %v632_v41  ;;  %v888_v0 = vadd.f32 %v887_v61, %v886_v12  ;;  %v836_v43 = vadd.f32 %v835_v9, %v834_v4 }
 0x2f4   :  { %v889_v2 = vrot.slane %v888_v0, 2  ;;  %v635_v3 = vrot.slane %v634_v62, 1  ;;  %v837_v5 = vrot.slane %v836_v43, 1 }
 0x2f6   :  { %v890_v45 = vadd.f32 %v889_v2, %v888_v0  ;;  %v636_v6 = vadd.f32 %v635_v3, %v634_v62  ;;  %v838_v7 = vadd.f32 %v837_v5, %v836_v43 }
 0x2f8   :  { %930 = vpush %v636_v6  ;;  %v891_v11 = vrot.slane %v890_v45, 1 }
 0x2f9   :  { %932 = vpush %v737_v10 }
 0x2fa   :  { %934 = vpush %v838_v7  ;;  %v892_v13 = vadd.f32 %v891_v11, %v890_v45 }
 0x2fc   :  { %936 = vpush %v892_v13 }
 0x329   :  { %s931_s26 = spop %930 }
 0x32a   :  { %s933_s27 = spop %932 }
 0x32b   :  { %s739_s28 = sadd.f32 %s933_s27, %s931_s26  ;;  %s935_s29 = spop %934 }
 0x32d   :  { %v741_v14 = vstv %s739_s28  ;;  %s937_s30 = spop %936 }
 0x32e   :  { %s894_s7 = sadd.f32 %s937_s30, %s935_s29  ;;  %743 = vst [vmem:[%s1403_s6 + $0x18] sm:$0xff] %v741_v14 }
 0x330   :  { %v896_v15 = vstv %s894_s7 }
 0x331   :  { %898 = vst [vmem:[%s1403_s6 + $0x20] sm:$0xff] %v896_v15 }
 0x332   :  { %903 = vsyncpa [#allocation3], 1 }
 0x333   :  { %904 = vsyncpa [#allocation5], 1 }
 0x334   :  { %905 = vsyncpa [#allocation8], 1 }

</bundles_post_ra>
